<compile_context>
chip_gen: v7x
topology: tpu7x:2x2x1
jax: 0.10.0
libtpu: 0.0.40
codegen_flags: <defaults>
</compile_context>

<pallas_src>
import jax
import jax.numpy as jnp
import numpy as np
from jax.experimental import pallas as pl
from jax.experimental.pallas import tpu as pltpu

# ----- "cfg" stand-ins ------------------------------------------------------
HOPS = 2          # cfg.localWL.hops
DIM_IN = 8        # node feature dim
DIM_INNER = 32    # cfg.gnn.dim_inner
DIM_OUT = 4       # task output dim
N_NODES = 16
N_GRAPHS = 2
N_EDGES = 40      # edges per hop (synthetic)
# cfg.localWL.pool='sum', cfg.model.graph_pooling='add', cfg.gnn.layers_post_mp=1,
# cfg.localWL.dropout applied with training=False -> identity.


def localwl_kernel(eps_ref, x_ref, w0_ref, b0_ref, pt_ref, wmlp_ref, bmlp_ref,
                   a_ref, pred_ref, h_scr, tile_scr, acc_scr):
    """Grid = (hops, row_tiles_of_A, contraction_tiles_of_A).

    h_scr   : VMEM (2, N, D) f32 ping-pong hop features (slot 0 seeded with x0).
    tile_scr: VMEM (TM, D) f32 row-tile accumulator for the current hop tile.
    acc_scr : VMEM (G, O_pad) f32 prediction accumulator.
    """
    hp = pl.program_id(0)          # hop being computed: h_{hp+1}
    m = pl.program_id(1)           # row tile of A[hp] / of h_{hp+1}
    c = pl.program_id(2)           # contraction tile (cols of A[hp] / rows of h_hp)
    nh = pl.num_programs(0)
    nm = pl.num_programs(1)
    nc = pl.num_programs(2)

    _, TM, TC = a_ref.shape
    rows = pl.ds(pl.multiple_of(m * TM, TM), TM)
    cols = pl.ds(pl.multiple_of(c * TC, TC), TC)
    slot_in = hp % 2               # holds h_hp
    slot_out = (hp + 1) % 2        # receives h_{hp+1}

    # ---- one-time init (first grid step): x0 = lins[0](x); seed the accumulator
    #      with the pooled (1+eps)*x0 term pushed through Wmlp slab 0.
    @pl.when((hp == 0) & (m == 0) & (c == 0))
    def _init():
        x0 = jnp.dot(x_ref[...], w0_ref[...],
                     preferred_element_type=jnp.float32) + b0_ref[...]
        h_scr[0] = x0
        g0 = jax.lax.dot_general(pt_ref[...], x0, (((0,), (0,)), ((), ())),
                                 preferred_element_type=jnp.float32)        # [G, D]
        acc_scr[...] = (1.0 + eps_ref[0, 0]) * jnp.dot(
            g0, wmlp_ref[0], preferred_element_type=jnp.float32)

    # ---- hop aggregation tile: h_{hp+1}[rows] (+)= A[hp][rows, cols] @ h_hp[cols]
    a_tile = a_ref[0].astype(jnp.float32)      # bf16 edge counts (exact) -> f32 MACs
    part = jnp.dot(a_tile, h_scr[slot_in, cols, :],
                   preferred_element_type=jnp.float32)

    @pl.when(c == 0)
    def _first():
        tile_scr[...] = part

    @pl.when(c > 0)
    def _accum():
        tile_scr[...] = tile_scr[...] + part

    # ---- row tile of h_{hp+1} complete: stream it through global add-pool and the
    #      matching Wmlp slab (the [N, (hops+1)*D] concat buffer is never built).
    @pl.when(c == nc - 1)
    def _finish_tile():
        h_tile = tile_scr[...]                                              # [TM, D]

        # Only persist the hop activation if a later hop will consume it.
        @pl.when(hp < nh - 1)
        def _store_hop():
            h_scr[slot_out, rows, :] = h_tile

        pooled = jax.lax.dot_general(pt_ref[rows, :], h_tile,
                                     (((0,), (0,)), ((), ())),
                                     preferred_element_type=jnp.float32)    # [G, D]
        acc_scr[...] = acc_scr[...] + jnp.dot(
            pooled, wmlp_ref[hp + 1], preferred_element_type=jnp.float32)

    # ---- final lane-dense store (output padded to 128 lanes; sliced in wrapper)
    @pl.when((hp == nh - 1) & (m == nm - 1) & (c == nc - 1))
    def _store():
        pred_ref[...] = acc_scr[...] + bmlp_ref[...]


def localwl_forward(x, eps, W0, b0, A, P, Wmlp, bmlp, *, tile_m=None, tile_c=None):
    N, _ = x.shape
    D = W0.shape[1]
    G = P.shape[0]
    hops = A.shape[0]
    O = Wmlp.shape[1]
    assert Wmlp.shape[0] == (hops + 1) * D

    # A tiles: biggest that divides N, capped so the (bf16) double-buffered tile
    # stays comfortably inside scoped VMEM on v5e/v6e/v7x.
    TM = tile_m if tile_m is not None else min(N, 512)
    TC = tile_c if tile_c is not None else min(N, 512)
    assert N % TM == 0 and N % TC == 0

    O_pad = 128 * pl.cdiv(O, 128)                       # lane-dense output store

    A_bf16 = A.astype(jnp.bfloat16)                     # integer edge counts: exact
    PT = jnp.transpose(P)                               # (N, G): pool via sublane slices
    Wmlp_r = jnp.pad(jnp.reshape(Wmlp, (hops + 1, D, O)),
                     ((0, 0), (0, 0), (0, O_pad - O)))
    bmlp_p = jnp.pad(bmlp, ((0, 0), (0, O_pad - O)))
    eps_arr = jnp.reshape(eps, (1, 1)).astype(jnp.float32)

    vmem = pl.BlockSpec(memory_space=pltpu.MemorySpace.VMEM)
    grid = (hops, N // TM, N // TC)

    pred_pad = pl.pallas_call(
        localwl_kernel,
        grid=grid,
        out_shape=jax.ShapeDtypeStruct((G, O_pad), jnp.float32),
        in_specs=[
            pl.BlockSpec(memory_space=pltpu.MemorySpace.SMEM),   # eps (scalar)
            vmem,                                                # x        [N, dim_in]
            vmem,                                                # W0       [dim_in, D]
            vmem,                                                # b0       [1, D]
            vmem,                                                # P^T      [N, G]
            vmem,                                                # Wmlp     [hops+1, D, O_pad]
            vmem,                                                # bmlp     [1, O_pad]
            pl.BlockSpec((1, TM, TC), lambda hp, m, c: (hp, m, c)),  # A tiles (HBM->VMEM pipelined)
        ],
        out_specs=pl.BlockSpec((G, O_pad), lambda hp, m, c: (0, 0)),
        scratch_shapes=[
            pltpu.VMEM((2, N, D), jnp.float32),        # ping-pong hop features
            pltpu.VMEM((TM, D), jnp.float32),          # row-tile accumulator
            pltpu.VMEM((G, O_pad), jnp.float32),       # prediction accumulator
        ],
        compiler_params=pltpu.CompilerParams(
            # hop chain + shared accumulator are sequential -> all axes arbitrary.
            dimension_semantics=("arbitrary", "arbitrary", "arbitrary")),
    )(eps_arr, x, W0, b0, PT, Wmlp_r, bmlp_p, A_bf16)
    return pred_pad[:, :O]


def ref_forward(x, eps, W0, b0, A, P, Wmlp, bmlp):
    """Pure-JAX reference mirroring the PyTorch forward."""
    x0 = x @ W0 + b0
    outs = [(1.0 + eps) * x0]
    h = x0
    for k in range(A.shape[0]):
        h = A[k] @ h
        outs.append(h)
    out = jnp.concatenate(outs, axis=1)      # dropout (eval) == identity
    gemb = P @ out                           # global add-pool
    return gemb @ Wmlp + bmlp                # post-MP Linear (MLP, 1 layer)


if __name__ == "__main__":
    key = jax.random.PRNGKey(0)
    ks = jax.random.split(key, 12)

    # ----- synthetic batch ---------------------------------------------------
    x = jax.random.normal(ks[0], (N_NODES, DIM_IN), jnp.float32)
    batch_vec = jnp.repeat(jnp.arange(N_GRAPHS), N_NODES // N_GRAPHS)      # node -> graph id
    graph_label = jnp.arange(N_GRAPHS, dtype=jnp.int32)                    # passthrough label

    agg_scatter = [jax.random.randint(ks[1 + h], (N_EDGES,), 0, N_NODES) for h in range(HOPS)]
    agg_node_index = [jax.random.randint(ks[3 + h], (N_EDGES,), 0, N_NODES) for h in range(HOPS)]

    # Dense aggregation matrices: A[h][i, j] = #edges e with agg_node_index[e]==i, agg_scatter[e]==j.
    # scatter_reduce('sum', include_self=False) on a zero base == A[h] @ h.
    A = jnp.stack([
        jnp.zeros((N_NODES, N_NODES), jnp.float32)
           .at[agg_node_index[h], agg_scatter[h]].add(1.0)
        for h in range(HOPS)
    ])
    # Pooling matrix for global_add_pool.
    P = jnp.zeros((N_GRAPHS, N_NODES), jnp.float32).at[batch_vec, jnp.arange(N_NODES)].set(1.0)

    # ----- deterministic parameters -----------------------------------------
    def lin_init(k, fan_in, fan_out):
        bound = 1.0 / np.sqrt(fan_in)
        kw, kb = jax.random.split(k)
        W = jax.random.uniform(kw, (fan_in, fan_out), jnp.float32, -bound, bound)
        b = jax.random.uniform(kb, (1, fan_out), jnp.float32, -bound, bound)
        return W, b

    W0, b0 = lin_init(ks[6], DIM_IN, DIM_INNER)
    # lins[1..HOPS] exist in __init__ but are unused in forward(); initialized for fidelity only.
    _unused_lins = [lin_init(ks[7 + h], DIM_INNER, DIM_INNER) for h in range(HOPS)]
    eps = jnp.ones((1,), jnp.float32)[0]                                   # nn.Parameter(torch.ones(1))
    Wmlp, bmlp = lin_init(ks[10], DIM_INNER * (HOPS + 1), DIM_OUT)

    # ----- run kernel --------------------------------------------------------
    pred = localwl_forward(x, eps, W0, b0, A, P, Wmlp, bmlp)
    pred = jax.block_until_ready(pred)
    label = graph_label                                                     # (pred, label) as in forward

    ref = ref_forward(x, eps, W0, b0, A, P, Wmlp, bmlp)
    np.testing.assert_allclose(np.asarray(pred), np.asarray(ref), rtol=1e-4, atol=1e-4)

    print("KERNEL_OK")
</pallas_src>

<mosaic_0001>
module attributes {stable_mosaic.version = 11 : i64} {
  func.func @localwl_kernel(%arg0: i32, %arg1: i32, %arg2: i32, %arg3: memref<1x1xf32, #tpu.memory_space<smem>>, %arg4: memref<16x8xf32, #tpu.memory_space<vmem>>, %arg5: memref<8x32xf32, #tpu.memory_space<vmem>>, %arg6: memref<1x32xf32, #tpu.memory_space<vmem>>, %arg7: memref<16x2xf32, #tpu.memory_space<vmem>>, %arg8: memref<3x32x128xf32, #tpu.memory_space<vmem>>, %arg9: memref<1x128xf32, #tpu.memory_space<vmem>>, %arg10: memref<1x16x16xbf16, #tpu.memory_space<vmem>>, %arg11: memref<2x128xf32, #tpu.memory_space<vmem>>, %arg12: memref<2x16x32xf32, #tpu.memory_space<vmem>>, %arg13: memref<16x32xf32, #tpu.memory_space<vmem>>, %arg14: memref<2x128xf32, #tpu.memory_space<vmem>>) attributes {dimension_semantics = [#tpu.dimension_semantics<arbitrary>, #tpu.dimension_semantics<arbitrary>, #tpu.dimension_semantics<arbitrary>], iteration_bounds = array<i64: 2, 1, 1>, scalar_prefetch = 0 : i64, scratch_operands = 3 : i64, tpu.core_type = #tpu.core_type<tc>, window_params = [{transform_indices = @transform_0, window_bounds = array<i64: 1, 1>}, {pipeline_mode = #tpu.pipeline_mode<synchronous>, transform_indices = @transform_1, window_bounds = array<i64: 16, 8>}, {pipeline_mode = #tpu.pipeline_mode<synchronous>, transform_indices = @transform_2, window_bounds = array<i64: 8, 32>}, {pipeline_mode = #tpu.pipeline_mode<synchronous>, transform_indices = @transform_3, window_bounds = array<i64: 1, 32>}, {pipeline_mode = #tpu.pipeline_mode<synchronous>, transform_indices = @transform_4, window_bounds = array<i64: 16, 2>}, {pipeline_mode = #tpu.pipeline_mode<synchronous>, transform_indices = @transform_5, window_bounds = array<i64: 3, 32, 128>}, {pipeline_mode = #tpu.pipeline_mode<synchronous>, transform_indices = @transform_6, window_bounds = array<i64: 1, 128>}, {transform_indices = @transform_7, window_bounds = array<i64: 1, 16, 16>}, {pipeline_mode = #tpu.pipeline_mode<synchronous>, transform_indices = @transform_8, window_bounds = array<i64: 2, 128>}]} {
    %c16_i32 = arith.constant 16 : i32
    %0 = arith.muli %arg1, %c16_i32 : i32
    %1 = tpu.assume_multiple %0, 16 : i32
    %c16_i32_0 = arith.constant 16 : i32
    %2 = arith.muli %arg2, %c16_i32_0 : i32
    %3 = tpu.assume_multiple %2, 16 : i32
    %c2_i32 = arith.constant 2 : i32
    %c0_i32 = arith.constant 0 : i32
    %4 = arith.cmpi eq, %c2_i32, %c0_i32 : i32
    %c1_i32 = arith.constant 1 : i32
    %5 = arith.select %4, %c1_i32, %c2_i32 : i32
    %6 = arith.remsi %arg0, %5 : i32
    %c0_i32_1 = arith.constant 0 : i32
    %7 = arith.cmpi ne, %6, %c0_i32_1 : i32
    %c0_i32_2 = arith.constant 0 : i32
    %8 = arith.cmpi slt, %6, %c0_i32_2 : i32
    %c0_i32_3 = arith.constant 0 : i32
    %9 = arith.cmpi slt, %5, %c0_i32_3 : i32
    %10 = arith.xori %8, %9 : i1
    %11 = arith.andi %10, %7 : i1
    %12 = arith.addi %6, %5 : i32
    %13 = arith.select %11, %12, %6 : i32
    %c1_i32_4 = arith.constant 1 : i32
    %14 = arith.addi %arg0, %c1_i32_4 : i32
    %c2_i32_5 = arith.constant 2 : i32
    %c0_i32_6 = arith.constant 0 : i32
    %15 = arith.cmpi eq, %c2_i32_5, %c0_i32_6 : i32
    %c1_i32_7 = arith.constant 1 : i32
    %16 = arith.select %15, %c1_i32_7, %c2_i32_5 : i32
    %17 = arith.remsi %14, %16 : i32
    %c0_i32_8 = arith.constant 0 : i32
    %18 = arith.cmpi ne, %17, %c0_i32_8 : i32
    %c0_i32_9 = arith.constant 0 : i32
    %19 = arith.cmpi slt, %17, %c0_i32_9 : i32
    %c0_i32_10 = arith.constant 0 : i32
    %20 = arith.cmpi slt, %16, %c0_i32_10 : i32
    %21 = arith.xori %19, %20 : i1
    %22 = arith.andi %21, %18 : i1
    %23 = arith.addi %17, %16 : i32
    %24 = arith.select %22, %23, %17 : i32
    %c0_i32_11 = arith.constant 0 : i32
    %25 = arith.cmpi eq, %arg0, %c0_i32_11 : i32
    %c0_i32_12 = arith.constant 0 : i32
    %26 = arith.cmpi eq, %arg1, %c0_i32_12 : i32
    %27 = arith.andi %25, %26 : i1
    %c0_i32_13 = arith.constant 0 : i32
    %28 = arith.cmpi eq, %arg2, %c0_i32_13 : i32
    %29 = arith.andi %27, %28 : i1
    %30 = arith.extui %29 : i1 to i32
    %c0_i32_14 = arith.constant 0 : i32
    %31 = arith.cmpi ne, %30, %c0_i32_14 : i32
    scf.if %31 {
      %c0_28 = arith.constant 0 : index
      %c0_29 = arith.constant 0 : index
      %56 = vector.load %arg4[%c0_28, %c0_29] : memref<16x8xf32, #tpu.memory_space<vmem>>, vector<16x8xf32>
      %c0_30 = arith.constant 0 : index
      %c0_31 = arith.constant 0 : index
      %57 = vector.load %arg5[%c0_30, %c0_31] : memref<8x32xf32, #tpu.memory_space<vmem>>, vector<8x32xf32>
      %cst_32 = arith.constant dense<0.000000e+00> : vector<16x32xf32>
      %58 = tpu.matmul %56, %57, %cst_32 {dimension_numbers = #tpu.dot_dimension_numbers<[1], [0], [0], [1], [0, 0, 1, 1], [], []>} : vector<16x8xf32>, vector<8x32xf32>, vector<16x32xf32> -> vector<16x32xf32>
      %c0_33 = arith.constant 0 : index
      %c0_34 = arith.constant 0 : index
      %59 = vector.load %arg6[%c0_33, %c0_34] : memref<1x32xf32, #tpu.memory_space<vmem>>, vector<1x32xf32>
      %60 = vector.broadcast %59 : vector<1x32xf32> to vector<16x32xf32>
      %61 = arith.addf %58, %60 : vector<16x32xf32>
      %c0_35 = arith.constant 0 : index
      %c0_36 = arith.constant 0 : index
      %c0_37 = arith.constant 0 : index
      %62 = vector.load %arg12[%c0_35, %c0_36, %c0_37] : memref<2x16x32xf32, #tpu.memory_space<vmem>>, vector<1x16x32xf32>
      %63 = vector.shape_cast %62 : vector<1x16x32xf32> to vector<16x32xf32>
      %64 = vector.shape_cast %61 : vector<16x32xf32> to vector<1x16x32xf32>
      tpu.vector_store %arg12[%c0_35, %c0_36, %c0_37], %64 {strides = array<i32>} : memref<2x16x32xf32, #tpu.memory_space<vmem>>, vector<1x16x32xf32>,
      %c0_38 = arith.constant 0 : index
      %c0_39 = arith.constant 0 : index
      %65 = vector.load %arg7[%c0_38, %c0_39] : memref<16x2xf32, #tpu.memory_space<vmem>>, vector<16x2xf32>
      %cst_40 = arith.constant dense<0.000000e+00> : vector<2x32xf32>
      %66 = tpu.matmul %65, %61, %cst_40 {dimension_numbers = #tpu.dot_dimension_numbers<[0], [0], [1], [1], [0, 1, 1, 1], [], []>} : vector<16x2xf32>, vector<16x32xf32>, vector<2x32xf32> -> vector<2x32xf32>
      %c0_41 = arith.constant 0 : index
      %c0_42 = arith.constant 0 : index
      %67 = memref.load %arg3[%c0_41, %c0_42] : memref<1x1xf32, #tpu.memory_space<smem>>
      %cst_43 = arith.constant 1.000000e+00 : f32
      %68 = arith.addf %cst_43, %67 : f32
      %c0_44 = arith.constant 0 : index
      %c0_45 = arith.constant 0 : index
      %c0_46 = arith.constant 0 : index
      %69 = vector.load %arg8[%c0_44, %c0_45, %c0_46] : memref<3x32x128xf32, #tpu.memory_space<vmem>>, vector<1x32x128xf32>
      %70 = vector.shape_cast %69 : vector<1x32x128xf32> to vector<32x128xf32>
      %cst_47 = arith.constant dense<0.000000e+00> : vector<2x128xf32>
      %71 = tpu.matmul %66, %70, %cst_47 {dimension_numbers = #tpu.dot_dimension_numbers<[1], [0], [0], [1], [0, 0, 1, 1], [], []>} : vector<2x32xf32>, vector<32x128xf32>, vector<2x128xf32> -> vector<2x128xf32>
      %72 = vector.broadcast %68 : f32 to vector<2x128xf32>
      %73 = arith.mulf %72, %71 : vector<2x128xf32>
      %c0_48 = arith.constant 0 : index
      %c0_49 = arith.constant 0 : index
      %74 = vector.load %arg14[%c0_48, %c0_49] : memref<2x128xf32, #tpu.memory_space<vmem>>, vector<2x128xf32>
      tpu.vector_store %arg14[%c0_48, %c0_49], %73 {strides = array<i32>} : memref<2x128xf32, #tpu.memory_space<vmem>>, vector<2x128xf32>,
    } else {
    }
    %c0 = arith.constant 0 : index
    %c0_15 = arith.constant 0 : index
    %c0_16 = arith.constant 0 : index
    %32 = vector.load %arg10[%c0, %c0_15, %c0_16] : memref<1x16x16xbf16, #tpu.memory_space<vmem>>, vector<1x16x16xbf16>
    %33 = vector.shape_cast %32 : vector<1x16x16xbf16> to vector<16x16xbf16>
    %34 = arith.extf %33 : vector<16x16xbf16> to vector<16x16xf32>
    %35 = arith.index_cast %13 : i32 to index
    %36 = arith.index_cast %3 : i32 to index
    %c0_17 = arith.constant 0 : index
    %37 = vector.load %arg12[%35, %36, %c0_17] : memref<2x16x32xf32, #tpu.memory_space<vmem>>, vector<1x16x32xf32>
    %38 = vector.shape_cast %37 : vector<1x16x32xf32> to vector<16x32xf32>
    %cst = arith.constant dense<0.000000e+00> : vector<16x32xf32>
    %39 = tpu.matmul %34, %38, %cst {dimension_numbers = #tpu.dot_dimension_numbers<[1], [0], [0], [1], [0, 0, 1, 1], [], []>} : vector<16x16xf32>, vector<16x32xf32>, vector<16x32xf32> -> vector<16x32xf32>
    %c0_i32_18 = arith.constant 0 : i32
    %40 = arith.cmpi eq, %arg2, %c0_i32_18 : i32
    %41 = arith.extui %40 : i1 to i32
    %c0_i32_19 = arith.constant 0 : i32
    %42 = arith.cmpi ne, %41, %c0_i32_19 : i32
    scf.if %42 {
      %c0_28 = arith.constant 0 : index
      %c0_29 = arith.constant 0 : index
      %56 = vector.load %arg13[%c0_28, %c0_29] : memref<16x32xf32, #tpu.memory_space<vmem>>, vector<16x32xf32>
      tpu.vector_store %arg13[%c0_28, %c0_29], %39 {strides = array<i32>} : memref<16x32xf32, #tpu.memory_space<vmem>>, vector<16x32xf32>,
    } else {
    }
    %c0_i32_20 = arith.constant 0 : i32
    %43 = arith.cmpi sgt, %arg2, %c0_i32_20 : i32
    %44 = arith.extui %43 : i1 to i32
    %c0_i32_21 = arith.constant 0 : i32
    %45 = arith.cmpi ne, %44, %c0_i32_21 : i32
    scf.if %45 {
      %c0_28 = arith.constant 0 : index
      %c0_29 = arith.constant 0 : index
      %56 = vector.load %arg13[%c0_28, %c0_29] : memref<16x32xf32, #tpu.memory_space<vmem>>, vector<16x32xf32>
      %57 = arith.addf %56, %39 : vector<16x32xf32>
      %c0_30 = arith.constant 0 : index
      %c0_31 = arith.constant 0 : index
      %58 = vector.load %arg13[%c0_30, %c0_31] : memref<16x32xf32, #tpu.memory_space<vmem>>, vector<16x32xf32>
      tpu.vector_store %arg13[%c0_30, %c0_31], %57 {strides = array<i32>} : memref<16x32xf32, #tpu.memory_space<vmem>>, vector<16x32xf32>,
    } else {
    }
    %c0_i32_22 = arith.constant 0 : i32
    %46 = arith.cmpi eq, %arg2, %c0_i32_22 : i32
    %47 = arith.extui %46 : i1 to i32
    %c0_i32_23 = arith.constant 0 : i32
    %48 = arith.cmpi ne, %47, %c0_i32_23 : i32
    scf.if %48 {
      %c0_28 = arith.constant 0 : index
      %c0_29 = arith.constant 0 : index
      %56 = vector.load %arg13[%c0_28, %c0_29] : memref<16x32xf32, #tpu.memory_space<vmem>>, vector<16x32xf32>
      %c1_i32_30 = arith.constant 1 : i32
      %57 = arith.cmpi slt, %arg0, %c1_i32_30 : i32
      %58 = arith.extui %57 : i1 to i32
      %c0_i32_31 = arith.constant 0 : i32
      %59 = arith.cmpi ne, %58, %c0_i32_31 : i32
      scf.if %59 {
        %71 = arith.index_cast %24 : i32 to index
        %72 = arith.index_cast %1 : i32 to index
        %c0_42 = arith.constant 0 : index
        %73 = vector.load %arg12[%71, %72, %c0_42] : memref<2x16x32xf32, #tpu.memory_space<vmem>>, vector<1x16x32xf32>
        %74 = vector.shape_cast %73 : vector<1x16x32xf32> to vector<16x32xf32>
        %75 = vector.shape_cast %56 : vector<16x32xf32> to vector<1x16x32xf32>
        tpu.vector_store %arg12[%71, %72, %c0_42], %75 {strides = array<i32>} : memref<2x16x32xf32, #tpu.memory_space<vmem>>, vector<1x16x32xf32>,
      } else {
      }
      %60 = arith.index_cast %1 : i32 to index
      %c0_32 = arith.constant 0 : index
      %61 = vector.load %arg7[%60, %c0_32] : memref<16x2xf32, #tpu.memory_space<vmem>>, vector<16x2xf32>
      %cst_33 = arith.constant dense<0.000000e+00> : vector<2x32xf32>
      %62 = tpu.matmul %61, %56, %cst_33 {dimension_numbers = #tpu.dot_dimension_numbers<[0], [0], [1], [1], [0, 1, 1, 1], [], []>} : vector<16x2xf32>, vector<16x32xf32>, vector<2x32xf32> -> vector<2x32xf32>
      %c0_34 = arith.constant 0 : index
      %c0_35 = arith.constant 0 : index
      %63 = vector.load %arg14[%c0_34, %c0_35] : memref<2x128xf32, #tpu.memory_space<vmem>>, vector<2x128xf32>
      %c1_i32_36 = arith.constant 1 : i32
      %64 = arith.addi %arg0, %c1_i32_36 : i32
      %65 = arith.index_cast %64 : i32 to index
      %c0_37 = arith.constant 0 : index
      %c0_38 = arith.constant 0 : index
      %66 = vector.load %arg8[%65, %c0_37, %c0_38] : memref<3x32x128xf32, #tpu.memory_space<vmem>>, vector<1x32x128xf32>
      %67 = vector.shape_cast %66 : vector<1x32x128xf32> to vector<32x128xf32>
      %cst_39 = arith.constant dense<0.000000e+00> : vector<2x128xf32>
      %68 = tpu.matmul %62, %67, %cst_39 {dimension_numbers = #tpu.dot_dimension_numbers<[1], [0], [0], [1], [0, 0, 1, 1], [], []>} : vector<2x32xf32>, vector<32x128xf32>, vector<2x128xf32> -> vector<2x128xf32>
      %69 = arith.addf %63, %68 : vector<2x128xf32>
      %c0_40 = arith.constant 0 : index
      %c0_41 = arith.constant 0 : index
      %70 = vector.load %arg14[%c0_40, %c0_41] : memref<2x128xf32, #tpu.memory_space<vmem>>, vector<2x128xf32>
      tpu.vector_store %arg14[%c0_40, %c0_41], %69 {strides = array<i32>} : memref<2x128xf32, #tpu.memory_space<vmem>>, vector<2x128xf32>,
    } else {
    }
    %c1_i32_24 = arith.constant 1 : i32
    %49 = arith.cmpi eq, %arg0, %c1_i32_24 : i32
    %c0_i32_25 = arith.constant 0 : i32
    %50 = arith.cmpi eq, %arg1, %c0_i32_25 : i32
    %51 = arith.andi %49, %50 : i1
    %c0_i32_26 = arith.constant 0 : i32
    %52 = arith.cmpi eq, %arg2, %c0_i32_26 : i32
    %53 = arith.andi %51, %52 : i1
    %54 = arith.extui %53 : i1 to i32
    %c0_i32_27 = arith.constant 0 : i32
    %55 = arith.cmpi ne, %54, %c0_i32_27 : i32
    scf.if %55 {
      %c0_28 = arith.constant 0 : index
      %c0_29 = arith.constant 0 : index
      %56 = vector.load %arg14[%c0_28, %c0_29] : memref<2x128xf32, #tpu.memory_space<vmem>>, vector<2x128xf32>
      %c0_30 = arith.constant 0 : index
      %c0_31 = arith.constant 0 : index
      %57 = vector.load %arg9[%c0_30, %c0_31] : memref<1x128xf32, #tpu.memory_space<vmem>>, vector<1x128xf32>
      %58 = vector.broadcast %57 : vector<1x128xf32> to vector<2x128xf32>
      %59 = arith.addf %56, %58 : vector<2x128xf32>
      %c0_32 = arith.constant 0 : index
      %c0_33 = arith.constant 0 : index
      %60 = vector.load %arg11[%c0_32, %c0_33] : memref<2x128xf32, #tpu.memory_space<vmem>>, vector<2x128xf32>
      tpu.vector_store %arg11[%c0_32, %c0_33], %59 {strides = array<i32>} : memref<2x128xf32, #tpu.memory_space<vmem>>, vector<2x128xf32>,
    } else {
    }
    return
  }
  func.func @transform_0(%arg0: i32, %arg1: i32, %arg2: i32) -> (i32, i32) {
    %c0_i32 = arith.constant 0 : i32
    %c0_i32_0 = arith.constant 0 : i32
    %c0_i32_1 = arith.constant 0 : i32
    return %c0_i32, %c0_i32_0 : i32, i32
  }
  func.func @transform_1(%arg0: i32, %arg1: i32, %arg2: i32) -> (i32, i32) {
    %c0_i32 = arith.constant 0 : i32
    %c0_i32_0 = arith.constant 0 : i32
    %c0_i32_1 = arith.constant 0 : i32
    return %c0_i32, %c0_i32_0 : i32, i32
  }
  func.func @transform_2(%arg0: i32, %arg1: i32, %arg2: i32) -> (i32, i32) {
    %c0_i32 = arith.constant 0 : i32
    %c0_i32_0 = arith.constant 0 : i32
    %c0_i32_1 = arith.constant 0 : i32
    return %c0_i32, %c0_i32_0 : i32, i32
  }
  func.func @transform_3(%arg0: i32, %arg1: i32, %arg2: i32) -> (i32, i32) {
    %c0_i32 = arith.constant 0 : i32
    %c0_i32_0 = arith.constant 0 : i32
    %c0_i32_1 = arith.constant 0 : i32
    return %c0_i32, %c0_i32_0 : i32, i32
  }
  func.func @transform_4(%arg0: i32, %arg1: i32, %arg2: i32) -> (i32, i32) {
    %c0_i32 = arith.constant 0 : i32
    %c0_i32_0 = arith.constant 0 : i32
    %c0_i32_1 = arith.constant 0 : i32
    return %c0_i32, %c0_i32_0 : i32, i32
  }
  func.func @transform_5(%arg0: i32, %arg1: i32, %arg2: i32) -> (i32, i32, i32) {
    %c0_i32 = arith.constant 0 : i32
    %c0_i32_0 = arith.constant 0 : i32
    %c0_i32_1 = arith.constant 0 : i32
    %c0_i32_2 = arith.constant 0 : i32
    return %c0_i32, %c0_i32_0, %c0_i32_1 : i32, i32, i32
  }
  func.func @transform_6(%arg0: i32, %arg1: i32, %arg2: i32) -> (i32, i32) {
    %c0_i32 = arith.constant 0 : i32
    %c0_i32_0 = arith.constant 0 : i32
    %c0_i32_1 = arith.constant 0 : i32
    return %c0_i32, %c0_i32_0 : i32, i32
  }
  func.func @transform_7(%arg0: i32, %arg1: i32, %arg2: i32) -> (i32, i32, i32) {
    %c0_i32 = arith.constant 0 : i32
    return %arg0, %arg1, %arg2 : i32, i32, i32
  }
  func.func @transform_8(%arg0: i32, %arg1: i32, %arg2: i32) -> (i32, i32) {
    %c0_i32 = arith.constant 0 : i32
    %c0_i32_0 = arith.constant 0 : i32
    %c0_i32_1 = arith.constant 0 : i32
    return %c0_i32, %c0_i32_0 : i32, i32
  }
}

</mosaic_0001>

<bundles_post_ra>
// kernel: tpu_custom_call.1
= control target key start
LH: loop header
LB: loop body
LE: loop exit
PB: predicated region body
PF: predicated region fallthrough
CT: control target
= control target key end

     0   :  { %s1589_s0 = inlined_call_operand.<no memory space> [shape: f32[1,1], index: 0, kind: input, shape index: {}]   ;;  %s1590_s1 = inlined_call_operand.vmem [shape: f32[16,8], index: 1, kind: input, shape index: {}]   ;;  %s1591_s2 = inlined_call_operand.vmem [shape: f32[8,32], index: 2, kind: input, shape index: {}]   ;;  %s1592_s3 = inlined_call_operand.vmem [shape: f32[1,32], index: 3, kind: input, shape index: {}]   ;;  %s1593_s4 = inlined_call_operand.vmem [shape: f32[16,2], index: 4, kind: input, shape index: {}]   ;;  %s1594_s5 = inlined_call_operand.hbm [shape: f32[3,32,128], index: 5, kind: input, shape index: {}]   ;;  %s1595_s6 = inlined_call_operand.vmem [shape: f32[1,128], index: 6, kind: input, shape index: {}]   ;;  %s1596_s7 = inlined_call_operand.vmem [shape: bf16[2,16,16], index: 7, kind: input, shape index: {}]   ;;  %s1597_s8 = inlined_call_operand.hbm [shape: f32[2,128], index: 8, kind: output, shape index: {}]  }
   0x1   :  { %13 = sst [smem:[#allocation5]] %s1589_s0 }
   0x2   :  { %14 = vsyncpa [#allocation7], 0 }
   0x3   :  { %15 = vsyncpa [#allocation8], 0  ;;  %s1434_s29 = smov 0   ;;  %s1436_s30 = smov 0  }
   0x4   :  { %s1438_s9 = smov 0  }
   0x5 LB: > { %s1098_s0 = sadd.s32 4294967295, %s1374_s9   ;;  %s40_s10 = sadd.s32 1, %s1370_s30  ;;  %s1374_s9 = sphi %s1438_s9, %s21_s9   ;;  %s1370_s30 = sphi %s1436_s30, %s1608_s30   ;;  %s1366_s29 = sphi %s1434_s29, %s1607_s29  }
   0x6   : > { %p42_p0 = scmp.ge.s32.totalorder %s40_s10, 2  ;;  %p1099_p1 = scmp.ge.s32.totalorder %s1374_s9, 1 }
   0x7   : > { %p243_p2 = scmp.lt.s32.totalorder %s1374_s9, 3  ;;  %p1461_p4 = scmp.eq.s32.totalorder %s1098_s0, 0 }
   0x8   : > { %s1610_s10 = smov (%p42_p0, %s40_s10), 0  ;;  %s1376_s13 = smov [#allocation6]  }
   0x9   : > { %p1455_p3 = pnand %p1099_p1, %p243_p2  ;;  %s270_s14 = sshll.u32 %s1376_s13, 4  ;;  %s271_s14 = int_to_ptr.vmem [resolvable:$true] %s270_s14 }
   0xa   : > { %s1602_s12 = scalar_select %p1461_p4, 1, 0 }
   0xb   : > { %s1601_s11 = scalar_select %p1455_p3, 1, 0 }
   0xc   : > { %p1248_p5 = pneg %p1455_p3  ;;  %s1290_s18 = scalar_lea.hbm %s1594_s5, 1536 }
   0xd   : > { %p1291_p7 = scmp.ne.s32.totalorder %s1594_s5, %s1290_s18  ;;  %p1297_p11 = scmp.lt.u32.totalorder %s1290_s18, %s1594_s5 }
   0xe   : > { %p1469_p6 = pnand %p1461_p4, %p1248_p5 }
  0x10   : > { %p1292_p8 = pneg %p1469_p6 }
  0x12   : > { %p1293_p9 = pnand %p1292_p8, %p1291_p7 }
  0x14   : > { %p1294_p10 = pneg %p1293_p9 }
  0x16   : > { %p1299_p12 = pnand %p1297_p11, %p1294_p10 }
  0x18   : > { %1302 = shalt.err (!%p1299_p12)
}
  0x19   : > { %s1303_s23 = scalar_lea.vmem %s271_s14, 1536  ;;  %p1311_p2 = scmp.lt.s32.totalorder %s271_s14, %s271_s14 }
  0x1a   : > { %p1304_p13 = scmp.ne.s32.totalorder %s271_s14, %s1303_s23  ;;  %p1312_p5 = scmp.lt.s32.totalorder %s1303_s23, %s1303_s23 }
  0x1c   : > { %p1306_p0 = pnand %p1304_p13, %p1292_p8  ;;  %p1313_p4 = por %p1312_p5, %p1311_p2 }
  0x1e   : > { %p1307_p1 = pneg %p1306_p0 }
  0x20   : > { %p1314_p3 = pnand %p1313_p4, %p1307_p1 }
  0x22   : > { %1317 = shalt.err (!%p1314_p3)
}
  0x23   : > { %s1377_s24 = smov 128   ;;  %s1378_s25 = smov 8  }
  0x24   : > { %1251 = dma.hbm_to_vmem [thread:$0]  (!%p1469_p6), %s1594_s5, 1536, %s271_s14, [#allocation7], %s1377_s24, %s1377_s24, %s1378_s25  }
  0x25   : > { %p1604_p7 = scmp.ne.s32.totalorder %s1601_s11, 0 }
  0x26   : > { %p1605_p9 = scmp.ne.s32.totalorder (!%p1604_p7), %s1602_s12, 0 }
  0x27   : > { %305 = sbr.rel (%p1604_p7) target bundleno = 1527 (0x5f7), region = 52 }
  0x2e   : > { %1357 = dma.done.wait (%p1605_p9), [#allocation7], 1536  }
  0x2f   : > { %1359 = vsyncadd (%p1605_p9), [#allocation7], 4294965760  ;;  %p342_p3 = scmp.lt.s32.totalorder %s1366_s29, 1  ;;  %p356_p4 = scmp.lt.s32.totalorder %s1366_s29, 0 }
  0x30   : > { %s357_s28 = ssub.s32 0, %s1366_s29  ;;  %s368_s11 = sadd.s32 1, %s1366_s29 }
  0x31   : > { %s343_s13 = scalar_select %p342_p3, %s1366_s29, 1 }
  0x32   : > { %s1106_s14 = smin.u32 %s1366_s29, %s357_s28  ;;  %s370_s20 = ssub.s32 0, %s368_s11 }
  0x33   : > { %s1138_s15 = sshll.u32 %s343_s13, 3  ;;  %s359_s16 = sand.u32 1, %s1106_s14  }
  0x34   : > { %s1504_s12 = scalar_lea.vmem %s1596_s7, %s1138_s15  ;;  %s360_s19 = ssub.s32 0, %s359_s16 }
  0x35   : > { %s1612_s19 = smov (!%p356_p4, %s360_s19), %s359_s16  ;;  %p381_p6 = scmp.eq.s32.totalorder %s1366_s29, 0 }
  0x36   : > { %p1108_p8 = scmp.lt.s32.totalorder %s1612_s19, 0  ;;  %s366_s21 = sadd.s32 2, %s1612_s19  ;;  %v392_v0 = vld [vmem:[%s1591_s2] sm:$0xff] (%p381_p6)  ;;  %vm400_vm0 = vcmask (%p381_p6), 64512   ;;  %v391_v2 = vld [vmem:[%s1590_s1 + $0x8] sm:$0xff] (%p381_p6)  ;;  %v1379_v5 = vmov (%p381_p6), 0.0|0.0  }
  0x37   : > { %p369_p10 = scmp.lt.s32.totalorder %s368_s11, 0  ;;  %s1109_s22 = smin.u32 %s370_s20, %s368_s11  ;;  %v390_v1 = vld [vmem:[%s1590_s1] sm:$0xff] (%p381_p6)  ;;  %1170 = vmatprep.subr.mxu1 (%p381_p6), %v392_v0  ;;  %v486_v4 = vld [vmem:[%s1593_s4 + $0x8] sm:$0xff] (%p381_p6)  ;;  %1221 = vmatprep.subr.bf16.mxu0 (%p381_p6), %v1379_v5  ;;  %vm1380_vm1 = vmmov (%p381_p6), 0   ;;  %v1381_v6 = vmov (%p381_p6), 0.0   ;;  %v595_v7 = vld [vmem:[#allocation6] sm:$0xff] (%p381_p6) }
  0x38   : > { %s1614_s21 = smov (!%p1108_p8, %s366_s21), %s1612_s19  ;;  %s372_s23 = sand.u32 1, %s1109_s22   ;;  %1172 = vmatprep.mubr.msk.f32.mxu1 (%p381_p6), %vm400_vm0, %v390_v1  ;;  %v485_v3 = vld [vmem:[%s1593_s4] sm:$0xff] (%p381_p6)  ;;  %1171 = vmatpush3.msra.mxu1 (%p381_p6), %v392_v0  ;;  %v598_v11 = vld [vmem:[#allocation6 + $0x18] sm:$0xff] (%p381_p6)  ;;  %vm482_vm2 = vcmask (%p381_p6), 261120   ;;  %vm519_vm3 = vcmask (%p381_p6), 130048  }
  0x39   : > { %s373_s24 = ssub.s32 0, %s372_s23  ;;  %389 = sbr.rel (!%p381_p6) target bundleno = 704 (0x2c0), region = 60  ;;  %487 = vxpose.xlu0.b32.start [1/2] (short) (narrow) (%p381_p6), %v485_v3, 8  ;;  %1173 = vmatmul.mubr.msk.f32.vlgmr.msra.gmra.mrb[0].mxu1 (%p381_p6), %vm400_vm0, %v391_v2  ;;  %v596_v8 = vld [vmem:[#allocation6 + $0x8] sm:$0xff] (%p381_p6)  ;;  %v597_v9 = vld [vmem:[#allocation6 + $0x10] sm:$0xff] (%p381_p6) }
  0x3a   : > { %s1616_s24 = smov (!%p369_p10, %s373_s24), %s372_s23  ;;  %1218 = vmatprep.subr.bf16.mxu1 (%p381_p6), %v1379_v5  ;;  %1179 = vmatprep.mubr.msk.f32.mxu1 (%p381_p6), %vm1380_vm1, %v1381_v6  ;;  %v1222_v10 = vpack.c.bf16 (%p381_p6), %v596_v8, %v595_v7  ;;  %v1225_v12 = vpack.c.bf16 (%p381_p6), %v598_v11, %v597_v9  ;;  %v1114_v13 = vld [vmem:[%s1592_s3] ss:$0 sm:$0xff] (%p381_p6)  ;;  %s593_s22 = sld [smem:[#allocation5]] (%p381_p6) }
  0x3b   : > { %p1111_p11 = scmp.lt.s32.totalorder %s1616_s24, 0  ;;  %s379_s25 = sadd.s32 2, %s1616_s24  ;;  %1190 = vmatprep.mubr.msk.f32.mxu0 (%p381_p6), %vm1380_vm1, %v1381_v6 }
  0x3c   : > { %1223 = vmatpush3.bf16.msra.mxu0 (%p381_p6), %v1222_v10 }
  0x3d   : > { %s1618_s25 = smov (!%p1111_p11, %s379_s25), %s1616_s24  ;;  %488 = vxpose.xlu0.b32.end [2/2] (short) (narrow) (%p381_p6), %v486_v4, 8  ;;  %1224 = vmatprep.subr.bf16.mxu0 (%p381_p6), %v1379_v5 }
  0x40   : > { %1226 = vmatpush3.bf16.msra.mxu0 %v1225_v12  ;;  %s594_s23 = sadd.f32 1.0, %s593_s22 }
  0x42   : > { %v672_v22 = vstv %s594_s23 }
  0xb9   : > { %v503_v19 = vpop.trf.xlu0 }
 0x10c   : > { %v1174_v14 = vpop.f32.mrb[0].mxu1 }
 0x10d   : > { %v479_v15 = vadd.f32 %v1174_v14, %v1114_v13  ;;  %v473_v16 = vpop.f32.mrb[1].mxu1 }
 0x10e   : > { %v474_v17 = vadd.f32 %v1114_v13, %v473_v16 }
 0x10f   : > { %484 = vst.msk [vmem:[#allocation2 + $0x8] sm:$0xff] %vm482_vm2, %v479_v15 }
 0x110   : > { %483 = vst.msk [vmem:[#allocation2] sm:$0xff] %vm482_vm2, %v474_v17  ;;  %v1219_v18 = vpack.c.bf16 %v479_v15, %v474_v17 }
 0x112   : > { %1220 = vmatpush3.bf16.msra.mxu1 %v1219_v18 }
 0x115   : > { %1180 = vmatmul.mubr.msk.f32.vlgmr.msra.gmra.mrb[2].mxu1 %vm519_vm3, %v503_v19 }
 0x1e8   : > { %v589_v20 = vpop.f32.mrb[2].mxu1 }
 0x1e9   : > { %v1181_v21 = vpop.f32.mrb[3].mxu1  ;;  %1191 = vmatmul.mubr.msk.f32.vlgmr.msra.gmra.mrb[0].mxu0 %vm482_vm2, %v589_v20 }
 0x2bc   : > { %v668_v23 = vpop.f32.mrb[0].mxu0 }
 0x2bd   : > { %v673_v24 = vmul.f32 %v672_v22, %v668_v23  ;;  %v1192_v25 = vpop.f32.mrb[1].mxu0 }
 0x2bf   : > { %674 = vst [vmem:[#allocation4] sm:$0x3] %v673_v24 }
 0x2c0 PF: > { %s1119_s24 = sshll.u32 %s1614_s21, 4  ;;  %v1144_v26 = vld [vmem:[%s1504_s12] sm:$0xff]   ;;  %vm684_vm4 = vcmask 130048   ;;  %vm769_vm5 = vcmask 261120   ;;  %p1122_p12 = scmp.ge.s32.totalorder %s1366_s29, 1 }
 0x2c1   : > { %v1145_v27 = vunpack.c.l.bf16 %v1144_v26  ;;  %s681_s26 = scalar_lea.vmem [#allocation2], %s1119_s24  ;;  %v1146_v31 = vunpack.c.h.bf16 %v1144_v26  ;;  %s1123_s12 = sshll.u32 (!%p1122_p12), %s1618_s25, 4 }
 0x2c2   : > { %v682_v28 = vld [vmem:[%s681_s26] sm:$0xff]  ;;  %v683_v29 = vld [vmem:[%s681_s26 + $0x8] sm:$0xff]  ;;  %s794_s21 = scalar_lea.vmem (!%p1122_p12), [#allocation2], %s1123_s12 }
 0x2c3   : > { %v1227_v30 = vpack.c.bf16 %v683_v29, %v682_v28  ;;  %1197 = vmatprep.mubr.msk.f32.mxu1 %vm684_vm4, %v1145_v27 }
 0x2c5   : > { %1228 = vmatprep.subr.bf16.mxu1 %v1227_v30 }
 0x2c6   : > { %1230 = vmatpush3.bf16.msra.mxu1 %v1227_v30 }
 0x2c9   : > { %1198 = vmatmul.mubr.msk.f32.vlgmr.msra.gmra.mrb[0].mxu1 %vm684_vm4, %v1146_v31 }
 0x39c   : > { %v1199_v32 = vpop.f32.mrb[0].mxu1 }
 0x39d   : > { %771 = vst.msk [vmem:[#allocation3 + $0x8] sm:$0xff] %vm769_vm5, %v1199_v32  ;;  %v757_v33 = vpop.f32.mrb[1].mxu1 }
 0x39e   : > { %770 = vst.msk [vmem:[#allocation3] sm:$0xff] %vm769_vm5, %v757_v33 }
 0x39f   : > { %791 = sbr.rel (%p1122_p12) target bundleno = 935 (0x3a7), region = 76 }
 0x3a4   : > { %v787_v34 = vld [vmem:[#allocation3 + $0x8] sm:$0xff] }
 0x3a5   : > { %v786_v35 = vld [vmem:[#allocation3] sm:$0xff]  ;;  %797 = vst.msk [vmem:[%s794_s21 + $0x8] sm:$0xff] (!%p1122_p12), %vm769_vm5, %v787_v34 }
 0x3a6   : > { %796 = vst.msk [vmem:[%s794_s21] sm:$0xff] %vm769_vm5, %v786_v35 }
 0x3a7 PF: > { %v799_v36 = vld [vmem:[%s1593_s4] sm:$0xff]  ;;  %v1232_v37 = vpack.c.bf16 %v787_v34, %v786_v35  ;;  %v1382_v38 = vmov 0.0|0.0   ;;  %v800_v39 = vld [vmem:[%s1593_s4 + $0x8] sm:$0xff]  ;;  %vm1383_vm6 = vmmov 0   ;;  %v1384_v40 = vmov 0.0   ;;  %s1125_s25 = sshll.u32 %s1366_s29, 5 }
 0x3a8   : > { %801 = vxpose.xlu0.b32.start [1/2] (short) (narrow) %v799_v36, 8  ;;  %1231 = vmatprep.subr.bf16.mxu1 %v1382_v38  ;;  %s1058_s11 = scalar_lea.vmem [#allocation6], %s1125_s25  ;;  %p989_p13 = scmp.eq.s32.totalorder %s1366_s29, 1  ;;  %v906_v50 = vld [vmem:[#allocation4] sm:$0x3] }
 0x3a9   : > { %1233 = vmatpush3.bf16.msra.mxu1 %v1232_v37  ;;  %1204 = vmatprep.mubr.msk.f32.mxu1 %vm1383_vm6, %v1384_v40  ;;  %v1126_v41 = vld [vmem:[%s1058_s11 + $0x20] sm:$0xff]  ;;  %v1127_v42 = vld [vmem:[%s1058_s11 + $0x28] sm:$0xff]  ;;  %v1128_v43 = vld [vmem:[%s1058_s11 + $0x30] sm:$0xff] }
 0x3aa   : > { %1234 = vmatprep.subr.bf16.mxu0 %v1382_v38  ;;  %1215 = vmatprep.mubr.msk.f32.mxu0 %vm1383_vm6, %v1384_v40  ;;  %v1235_v44 = vpack.c.bf16 %v1127_v42, %v1126_v41  ;;  %v1129_v45 = vld [vmem:[%s1058_s11 + $0x38] sm:$0xff]  ;;  %v1133_v55 = vld [vmem:[%s1595_s6] ss:$0 sm:$0xff] (%p989_p13) }
 0x3ab   : > { %v1238_v46 = vpack.c.bf16 %v1129_v45, %v1128_v43 }
 0x3ac   : > { %802 = vxpose.xlu0.b32.end [2/2] (short) (narrow) %v800_v39, 8  ;;  %1236 = vmatpush3.bf16.msra.mxu0 %v1235_v44 }
 0x3ad   : > { %1237 = vmatprep.subr.bf16.mxu0 %v1382_v38 }
 0x3b0   : > { %1239 = vmatpush3.bf16.msra.mxu0 %v1238_v46 }
 0x428   : > { %v817_v47 = vpop.trf.xlu0 }
 0x429   : > { %1205 = vmatmul.mubr.msk.f32.vlgmr.msra.gmra.mrb[2].mxu1 %vm684_vm4, %v817_v47 }
 0x4fc   : > { %v902_v48 = vpop.f32.mrb[2].mxu1 }
 0x4fd   : > { %v1206_v49 = vpop.f32.mrb[3].mxu1  ;;  %1216 = vmatmul.mubr.msk.f32.vlgmr.msra.gmra.mrb[0].mxu0 %vm769_vm5, %v902_v48 }
 0x5cd   : > { %995 = sbr.rel (!%p989_p13) target bundleno = 1502 (0x5de), region = 80 }
 0x5d0   : > { %v983_v51 = vpop.f32.mrb[0].mxu0 }
 0x5d1   : > { %v987_v52 = vadd.f32 %v983_v51, %v906_v50  ;;  %v1217_v53 = vpop.f32.mrb[1].mxu0 }
 0x5d3   : > { %988 = vst [vmem:[#allocation4] sm:$0x3] %v987_v52 }
 0x5da   : > { %v996_v54 = vld [vmem:[#allocation4] sm:$0x3] }
 0x5db   : > { %v1004_v56 = vadd.f32 %v1133_v55, %v996_v54 }
 0x5dd   : > { %1005 = vst [vmem:[#allocation9] sm:$0x3] %v1004_v56 }
 0x5de PF: > { %p1554_p0 = scmp.eq.s32.totalorder %s1098_s0, 1  ;;  %s1385_s29 = smov [#allocation9]  }
 0x5df   : > { %s1013_s18 = sshll.u32 %s1385_s29, 4  ;;  %s1014_s18 = int_to_ptr.vmem [resolvable:$true] %s1013_s18 }
 0x5e0   : > { %s1318_s19 = scalar_lea.vmem %s1014_s18, 32  ;;  %p1325_p7 = scmp.lt.s32.totalorder %s1014_s18, %s1014_s18 }
 0x5e1   : > { %p1319_p1 = scmp.ne.s32.totalorder %s1014_s18, %s1318_s19  ;;  %p1326_p9 = scmp.lt.s32.totalorder %s1318_s19, %s1318_s19 }
 0x5e3   : > { %p1320_p2 = pnand %p1319_p1, %p1554_p0  ;;  %p1327_p3 = por %p1326_p9, %p1325_p7 }
 0x5e5   : > { %p1321_p5 = pneg %p1320_p2 }
 0x5e7   : > { %p1328_p4 = pnand %p1327_p3, %p1321_p5 }
 0x5e9   : > { %1331 = shalt.err (!%p1328_p4)
}
 0x5ea   : > { %s1332_s0 = scalar_lea.hbm %s1597_s8, 32 }
 0x5eb   : > { %p1333_p6 = scmp.ne.s32.totalorder %s1597_s8, %s1332_s0  ;;  %p1338_p11 = scmp.lt.u32.totalorder %s1332_s0, %s1597_s8 }
 0x5ed   : > { %p1334_p8 = pnand %p1333_p6, %p1554_p0 }
 0x5ef   : > { %p1335_p10 = pneg %p1334_p8 }
 0x5f1   : > { %p1340_p12 = pnand %p1338_p11, %p1335_p10 }
 0x5f3   : > { %1343 = shalt.err (!%p1340_p12)
}
 0x5f4   : > { %1245 = dma.vmem_to_hbm [thread:$0]  (%p1554_p0), %s1014_s18, 32, %s1597_s8, [#allocation8]  }
 0x5f5   : > { %1361 = dma.done.wait (%p1554_p0), [#allocation8], 32  }
 0x5f6   : > { %1363 = vsyncadd (%p1554_p0), [#allocation8], 4294967264 }
 0x5f7 PF: > { %s21_s9 = sadd.s32 1, %s1374_s9   ;;  %s1607_s29 = smov %s1370_s30 }
 0x5f8   : > { %p18_p13 = scmp.ge.s32.totalorder %s21_s9, 4   ;;  %s1608_s30 = smov %s1610_s10 }
 0x5fa   :  { %20 = sbr.rel (!%p18_p13) target bundleno = 5 (0x5), region = 112 }
 0x601   :  { %1026 = vsyncpa [#allocation7], 1 }
 0x602   :  { %1028 = vsyncpa [#allocation7 + $0x1], 1 }
 0x603   :  { %1029 = vsyncpa [#allocation8], 1 }
 0x604   :  { %1031 = vsyncpa [#allocation8 + $0x1], 1 }

</bundles_post_ra>
